<compile_context>
chip_gen: v6e
topology: v6e:2x2x1
jax: 0.10.0
libtpu: 0.0.40
codegen_flags: <defaults>
</compile_context>

<pallas_src>
import jax
import jax.numpy as jnp
from jax.experimental import pallas as pl
from jax.experimental.pallas import tpu as pltpu

QDIM = 3
# Row-major gather of the 3x3 symmetric matrix from the 6-vector:
#   positions (0,0)(0,1)(0,2)(1,0)(1,1)(1,2)(2,0)(2,1)(2,2)
_SM_FROM_L = (0, 3, 4, 3, 1, 5, 4, 5, 2)


# ------------------------------ unbatched path ------------------------------
def _symm3d_kernel(l_ref, o_ref):
    """Scatter the 6 SMEM scalars into the symmetric (3,3) SMEM output."""
    d0, d1, d2 = l_ref[0], l_ref[1], l_ref[2]      # diagonal l[:3]
    t10, t20, t21 = l_ref[3], l_ref[4], l_ref[5]   # strict-lower (1,0)(2,0)(2,1)
    o_ref[0, 0] = d0
    o_ref[1, 1] = d1
    o_ref[2, 2] = d2
    o_ref[1, 0] = t10
    o_ref[0, 1] = t10
    o_ref[2, 0] = t20
    o_ref[0, 2] = t20
    o_ref[2, 1] = t21
    o_ref[1, 2] = t21


def symm_3d_inertia_forward(l_param):
    """Module forward: (6,) parameter vector -> (3,3) symmetric matrix."""
    if l_param.dtype != jnp.float32:        # avoid an extra convert dispatch
        l_param = l_param.astype(jnp.float32)
    return pl.pallas_call(
        _symm3d_kernel,
        out_shape=jax.ShapeDtypeStruct((QDIM, QDIM), jnp.float32),
        in_specs=[pl.BlockSpec(memory_space=pltpu.MemorySpace.SMEM)],
        out_specs=pl.BlockSpec(memory_space=pltpu.MemorySpace.SMEM),
    )(l_param)


# ------------------------------- batched path -------------------------------
def _symm3d_batched_kernel(lT_ref, o_ref):
    # lT_ref: (6, lanes) VMEM; o_ref: (9, lanes) VMEM. Nine full-lane row
    # copies (lane-dense, unmasked stores) -- the batch lives on the lane axis.
    for out_row, src_row in enumerate(_SM_FROM_L):
        o_ref[out_row, :] = lT_ref[src_row, :]


def symm_3d_inertia_forward_batched(l_batch, *, lane_tile=512):
    """(B, 6) parameter vectors -> (B, 3, 3) symmetric matrices."""
    assert l_batch.ndim == 2 and l_batch.shape[1] == 2 * QDIM
    b = l_batch.shape[0]
    if l_batch.dtype != jnp.float32:
        l_batch = l_batch.astype(jnp.float32)

    # Batch on the lane axis, padded to a multiple of 128 (lane-dense output).
    b_pad = max(128, ((b + 127) // 128) * 128)
    if b_pad > lane_tile:                    # tile the lane axis for large B
        b_pad = ((b_pad + lane_tile - 1) // lane_tile) * lane_tile
    lT = jnp.zeros((2 * QDIM, b_pad), jnp.float32).at[:, :b].set(l_batch.T)

    if b_pad <= lane_tile:
        # Single grid-less invocation; whole tiles resident in VMEM.
        out = pl.pallas_call(
            _symm3d_batched_kernel,
            out_shape=jax.ShapeDtypeStruct((QDIM * QDIM, b_pad), jnp.float32),
            in_specs=[pl.BlockSpec(memory_space=pltpu.MemorySpace.VMEM)],
            out_specs=pl.BlockSpec(memory_space=pltpu.MemorySpace.VMEM),
        )(lT)
    else:
        # Grid over lane tiles; "parallel" lets v7x shard across its 2 TCs.
        out = pl.pallas_call(
            _symm3d_batched_kernel,
            out_shape=jax.ShapeDtypeStruct((QDIM * QDIM, b_pad), jnp.float32),
            grid=(b_pad // lane_tile,),
            in_specs=[pl.BlockSpec((2 * QDIM, lane_tile), lambda i: (0, i))],
            out_specs=pl.BlockSpec((QDIM * QDIM, lane_tile), lambda i: (0, i)),
            compiler_params=pltpu.CompilerParams(
                dimension_semantics=("parallel",)),
        )(lT)

    # Layout plumbing only: (9, B_pad) -> (B, 3, 3).
    return out[:, :b].T.reshape(b, QDIM, QDIM)


if __name__ == "__main__":
    key = jax.random.PRNGKey(0)
    k0, k1 = jax.random.split(key)
    init_param_std = 0.01

    # Deterministic init mirroring torch.empty(1, 6).normal_(0, 0.01).squeeze()
    l_param = init_param_std * jax.random.normal(k0, (6,), dtype=jnp.float32)

    # --- unbatched module forward -------------------------------------------
    out = jax.block_until_ready(symm_3d_inertia_forward(l_param))

    tril_r = jnp.array([1, 2, 2])
    tril_c = jnp.array([0, 0, 1])

    def _ref_one(l):
        lt = jnp.zeros((QDIM, QDIM), jnp.float32).at[tril_r, tril_c].set(l[QDIM:])
        return jnp.diag(l[:QDIM]) + lt + lt.T

    ref = _ref_one(l_param)
    assert out.shape == (QDIM, QDIM) and out.dtype == jnp.float32
    assert jnp.allclose(out, ref, atol=1e-7), (out, ref)

    # --- batched path (small B; lane axis padded internally to 128) ---------
    B = 2
    l_batch = init_param_std * jax.random.normal(k1, (B, 2 * QDIM), dtype=jnp.float32)
    out_b = jax.block_until_ready(symm_3d_inertia_forward_batched(l_batch))
    ref_b = jax.vmap(_ref_one)(l_batch)
    assert out_b.shape == (B, QDIM, QDIM)
    assert jnp.allclose(out_b, ref_b, atol=1e-7), (out_b, ref_b)

    print("KERNEL_OK")
</pallas_src>

<mosaic_0001>
module attributes {stable_mosaic.version = 11 : i64} {
  func.func @_symm3d_kernel(%arg0: memref<6xf32, #tpu.memory_space<smem>>, %arg1: memref<3x3xf32, #tpu.memory_space<smem>>) attributes {dimension_semantics = [], scalar_prefetch = 0 : i64, scratch_operands = 0 : i64, tpu.core_type = #tpu.core_type<tc>} {
    %c0 = arith.constant 0 : index
    %0 = memref.load %arg0[%c0] : memref<6xf32, #tpu.memory_space<smem>>
    %c1 = arith.constant 1 : index
    %1 = memref.load %arg0[%c1] : memref<6xf32, #tpu.memory_space<smem>>
    %c2 = arith.constant 2 : index
    %2 = memref.load %arg0[%c2] : memref<6xf32, #tpu.memory_space<smem>>
    %c3 = arith.constant 3 : index
    %3 = memref.load %arg0[%c3] : memref<6xf32, #tpu.memory_space<smem>>
    %c4 = arith.constant 4 : index
    %4 = memref.load %arg0[%c4] : memref<6xf32, #tpu.memory_space<smem>>
    %c5 = arith.constant 5 : index
    %5 = memref.load %arg0[%c5] : memref<6xf32, #tpu.memory_space<smem>>
    %c0_0 = arith.constant 0 : index
    %c0_1 = arith.constant 0 : index
    %6 = memref.load %arg1[%c0_0, %c0_1] : memref<3x3xf32, #tpu.memory_space<smem>>
    memref.store %0, %arg1[%c0_0, %c0_1] : memref<3x3xf32, #tpu.memory_space<smem>>
    %c1_2 = arith.constant 1 : index
    %c1_3 = arith.constant 1 : index
    %7 = memref.load %arg1[%c1_2, %c1_3] : memref<3x3xf32, #tpu.memory_space<smem>>
    memref.store %1, %arg1[%c1_2, %c1_3] : memref<3x3xf32, #tpu.memory_space<smem>>
    %c2_4 = arith.constant 2 : index
    %c2_5 = arith.constant 2 : index
    %8 = memref.load %arg1[%c2_4, %c2_5] : memref<3x3xf32, #tpu.memory_space<smem>>
    memref.store %2, %arg1[%c2_4, %c2_5] : memref<3x3xf32, #tpu.memory_space<smem>>
    %c1_6 = arith.constant 1 : index
    %c0_7 = arith.constant 0 : index
    %9 = memref.load %arg1[%c1_6, %c0_7] : memref<3x3xf32, #tpu.memory_space<smem>>
    memref.store %3, %arg1[%c1_6, %c0_7] : memref<3x3xf32, #tpu.memory_space<smem>>
    %c0_8 = arith.constant 0 : index
    %c1_9 = arith.constant 1 : index
    %10 = memref.load %arg1[%c0_8, %c1_9] : memref<3x3xf32, #tpu.memory_space<smem>>
    memref.store %3, %arg1[%c0_8, %c1_9] : memref<3x3xf32, #tpu.memory_space<smem>>
    %c2_10 = arith.constant 2 : index
    %c0_11 = arith.constant 0 : index
    %11 = memref.load %arg1[%c2_10, %c0_11] : memref<3x3xf32, #tpu.memory_space<smem>>
    memref.store %4, %arg1[%c2_10, %c0_11] : memref<3x3xf32, #tpu.memory_space<smem>>
    %c0_12 = arith.constant 0 : index
    %c2_13 = arith.constant 2 : index
    %12 = memref.load %arg1[%c0_12, %c2_13] : memref<3x3xf32, #tpu.memory_space<smem>>
    memref.store %4, %arg1[%c0_12, %c2_13] : memref<3x3xf32, #tpu.memory_space<smem>>
    %c2_14 = arith.constant 2 : index
    %c1_15 = arith.constant 1 : index
    %13 = memref.load %arg1[%c2_14, %c1_15] : memref<3x3xf32, #tpu.memory_space<smem>>
    memref.store %5, %arg1[%c2_14, %c1_15] : memref<3x3xf32, #tpu.memory_space<smem>>
    %c1_16 = arith.constant 1 : index
    %c2_17 = arith.constant 2 : index
    %14 = memref.load %arg1[%c1_16, %c2_17] : memref<3x3xf32, #tpu.memory_space<smem>>
    memref.store %5, %arg1[%c1_16, %c2_17] : memref<3x3xf32, #tpu.memory_space<smem>>
    return
  }
}

</mosaic_0001>

<bundles_post_ra>
// kernel: tpu_custom_call.1
= control target key start
LH: loop header
LB: loop body
LE: loop exit
PB: predicated region body
PF: predicated region fallthrough
CT: control target
= control target key end

     0   :  { %6 = vsyncpa [#allocation3], 0  ;;  %s103_s0 = inlined_call_operand.hbm [shape: f32[6], index: 0, kind: input, shape index: {}]   ;;  %s104_s1 = inlined_call_operand.hbm [shape: f32[3,3], index: 1, kind: output, shape index: {}]  }
   0x1   :  { %7 = vsyncpa [#allocation4], 0  ;;  %s85_s6 = smov [#allocation2]  }
   0x2   :  { %15 = dma.hbm_to_smem %s103_s0, 16, %s85_s6, [#allocation3]  }
   0x3   :  { %81 = dma.done.wait [#allocation3], 16  }
   0x4   :  { %82 = vsyncadd [#allocation3], 4294967280 }
   0x5   :  { %19 = sfence }
   0x6   :  { %s20_s9 = sld [smem:[#allocation2]]  ;;  %s86_s15 = smov [#allocation5]  }
   0x7   :  { %s58_s10 = sld [smem:[#allocation2 + $0x1]] }
   0x8   :  { %s59_s11 = sld [smem:[#allocation2 + $0x2]] }
   0x9   :  { %s60_s12 = sld [smem:[#allocation2 + $0x3]] }
   0xa   :  { %s61_s13 = sld [smem:[#allocation2 + $0x4]] }
   0xb   :  { %s62_s14 = sld [smem:[#allocation2 + $0x5]] }
   0xc   :  { %27 = sst [smem:[#allocation5]] %s20_s9 }
   0xd   :  { %29 = sst [smem:[#allocation5 + $0x81]] %s58_s10 }
   0xe   :  { %31 = sst [smem:[#allocation5 + $0x102]] %s59_s11 }
   0xf   :  { %33 = sst [smem:[#allocation5 + $0x80]] %s60_s12 }
  0x10   :  { %35 = sst [smem:[#allocation5 + $0x1]] %s60_s12 }
  0x11   :  { %37 = sst [smem:[#allocation5 + $0x100]] %s61_s13 }
  0x12   :  { %39 = sst [smem:[#allocation5 + $0x2]] %s61_s13 }
  0x13   :  { %41 = sst [smem:[#allocation5 + $0x101]] %s62_s14 }
  0x14   :  { %43 = sst [smem:[#allocation5 + $0x82]] %s62_s14 }
  0x15   :  { %51 = dma.smem_to_hbm %s86_s15, 64, %s104_s1, [#allocation4]  }
  0x16   :  { %83 = dma.done.wait [#allocation4], 64  }
  0x17   :  { %84 = vsyncadd [#allocation4], 4294967232 }
  0x18   :  { %55 = sfence }
  0x19   :  { %56 = vsyncpa [#allocation3], 1 }
  0x1a   :  { %57 = vsyncpa [#allocation4], 1 }

</bundles_post_ra>
